<compile_context>
chip_gen: v5e
topology: v5e:2x2
jax: 0.10.0
libtpu: 0.0.40
codegen_flags: <defaults>
</compile_context>

<pallas_src>
import jax
import jax.numpy as jnp
from jax.experimental import pallas as pl
from jax.experimental.pallas import tpu as pltpu


def _round_up(x, m):
    return (x + m - 1) // m * m


def _embed_kernel(ids_ref, table_hbm, out_ref, rows, sem):
    """Gather T embedding rows into one dense (T, D) output tile.

    ids_ref   : (N_pad,) int32 scalar-prefetch ref in SMEM (all token ids)
    table_hbm : (V, D) embedding table left in HBM (memory_space=pl.ANY)
    out_ref   : (T, D) output tile in VMEM (auto-pipelined by BlockSpec)
    rows      : (T, D) VMEM scratch the row-gather DMAs land in
    sem       : scalar DMA semaphore shared by the T equal-sized row copies
    """
    T = out_ref.shape[0]
    base = pl.program_id(0) * T

    # Issue all T row-gather DMAs (HBM table row -> VMEM scratch row).
    @pl.loop(0, T)
    def _(t):
        tok = ids_ref[base + t]
        pltpu.make_async_copy(
            table_hbm.at[pl.ds(tok, 1)], rows.at[pl.ds(t, 1)], sem
        ).start()

    # Wait for all T copies (they all signal the same sem with equal sizes).
    @pl.loop(0, T)
    def _(t):
        pltpu.make_async_copy(
            table_hbm.at[pl.ds(0, 1)], rows.at[pl.ds(t, 1)], sem
        ).wait()

    # One dense, unmasked (T, D) store into the pipelined output block.
    out_ref[...] = rows[...]


def embedder_forward(ids, table, *, max_tokens_per_tile=512):
    """Pallas equivalent of nn.Embedding(vocab_size, d_model)(ids)."""
    B, S = ids.shape
    V, D = table.shape
    itemsize = jnp.dtype(table.dtype).itemsize

    # Clamp ids: avoids data-dependent OOB DMAs into the table.
    flat_ids = jnp.clip(ids.reshape(-1).astype(jnp.int32), 0, V - 1)
    N = flat_ids.shape[0]

    # Token tile: sublane-aligned (multiple of 8), capped by a row budget and
    # a ~4 MiB scratch budget so it fits every generation's VMEM (v7x: 64 MiB)
    # with plenty of headroom for the double-buffered output blocks.
    cap_rows = max(8, ((4 * 1024 * 1024) // max(1, D * itemsize)) // 8 * 8)
    T = max(8, min(_round_up(N, 8), max_tokens_per_tile, cap_rows))

    N_pad = _round_up(N, T)
    flat_ids = jnp.pad(flat_ids, (0, N_pad - N))  # pad with id 0 (valid row)
    num_tiles = N_pad // T

    cost = pl.CostEstimate(
        flops=0,
        transcendentals=0,
        bytes_accessed=2 * N_pad * D * itemsize + N_pad * 4,
    )

    out_flat = pl.pallas_call(
        _embed_kernel,
        out_shape=jax.ShapeDtypeStruct((N_pad, D), table.dtype),
        grid_spec=pltpu.PrefetchScalarGridSpec(
            num_scalar_prefetch=1,
            grid=(num_tiles,),
            in_specs=[pl.BlockSpec(memory_space=pl.ANY)],  # table stays in HBM
            out_specs=pl.BlockSpec((T, D), lambda i, ids: (i, 0)),
            scratch_shapes=[
                pltpu.VMEM((T, D), table.dtype),
                pltpu.SemaphoreType.DMA,
            ],
        ),
        compiler_params=pltpu.CompilerParams(
            dimension_semantics=("parallel",),
            vmem_limit_bytes=64 * 1024 * 1024,
        ),
        cost_estimate=cost,
    )(flat_ids, table)

    return out_flat[:N].reshape(B, S, D)


if __name__ == "__main__":
    VOCAB_SIZE = 32
    D_MODEL = 128          # lane-aligned hidden size
    B, S = 2, 8

    key = jax.random.PRNGKey(0)
    k_ids, k_tab = jax.random.split(key)

    # Deterministic synthetic parameters (nn.Embedding weight ~ N(0, 1)).
    table = jax.random.normal(k_tab, (VOCAB_SIZE, D_MODEL), dtype=jnp.float32)
    ids = jax.random.randint(k_ids, (B, S), 0, VOCAB_SIZE, dtype=jnp.int32)

    out = embedder_forward(ids, table)
    out = jax.block_until_ready(out)

    # Reference check against plain JAX gather (same semantics as torch embed).
    ref = table[ids]
    assert out.shape == (B, S, D_MODEL)
    assert jnp.allclose(out, ref), "Pallas embedding mismatch vs reference"

    print("KERNEL_OK")
</pallas_src>

<mosaic_0001>
module attributes {stable_mosaic.version = 11 : i64} {
  func.func @_embed_kernel(%arg0: i32, %arg1: memref<16xi32, #tpu.memory_space<smem>>, %arg2: memref<32x128xf32, #tpu.memory_space<any>>, %arg3: memref<16x128xf32, #tpu.memory_space<vmem>>, %arg4: memref<16x128xf32, #tpu.memory_space<vmem>>, %arg5: memref<!tpu.dma_semaphore, #tpu.memory_space<semaphore_mem>>) attributes {dimension_semantics = [#tpu.dimension_semantics<parallel>], iteration_bounds = array<i64: 1>, scalar_prefetch = 1 : i64, scratch_operands = 2 : i64, tpu.core_type = #tpu.core_type<tc>, window_params = [{}, {transform_indices = @transform_1, window_bounds = array<i64: 16, 128>}]} {
    %c16_i32 = arith.constant 16 : i32
    %0 = arith.muli %arg0, %c16_i32 : i32
    %c0_i32 = arith.constant 0 : i32
    %c16_i32_0 = arith.constant 16 : i32
    %1 = arith.addi %c0_i32, %c16_i32_0 : i32
    %c1_i32 = arith.constant 1 : i32
    scf.for %arg6 = %c0_i32 to %1 step %c1_i32  : i32 {
      %c1_i32_9 = arith.constant 1 : i32
      %5 = arith.muli %arg6, %c1_i32_9 : i32
      %c0_i32_10 = arith.constant 0 : i32
      %6 = arith.addi %c0_i32_10, %5 : i32
      %7 = arith.addi %0, %6 : i32
      %8 = arith.index_cast %7 : i32 to index
      %9 = memref.load %arg1[%8] : memref<16xi32, #tpu.memory_space<smem>>
      %c0_i32_11 = arith.constant 0 : i32
      %10 = tpu.memref_slice %arg2[%9, %c0_i32_11] : memref<32x128xf32, #tpu.memory_space<any>> -> memref<1x128xf32, #tpu.memory_space<any>>
      %c0_i32_12 = arith.constant 0 : i32
      %11 = tpu.memref_slice %arg4[%6, %c0_i32_12] : memref<16x128xf32, #tpu.memory_space<vmem>> -> memref<1x128xf32, #tpu.memory_space<vmem>>
      tpu.enqueue_dma source(%10 : memref<1x128xf32, #tpu.memory_space<any>>) target(%11 : memref<1x128xf32, #tpu.memory_space<vmem>>) target_semaphore(%arg5 : memref<!tpu.dma_semaphore, #tpu.memory_space<semaphore_mem>>)
    }
    %c16_i32_1 = arith.constant 16 : i32
    %c0_i32_2 = arith.constant 0 : i32
    %c16_i32_3 = arith.constant 16 : i32
    %2 = arith.addi %c0_i32_2, %c16_i32_3 : i32
    %c1_i32_4 = arith.constant 1 : i32
    scf.for %arg6 = %c0_i32_2 to %2 step %c1_i32_4  : i32 {
      %c1_i32_9 = arith.constant 1 : i32
      %5 = arith.muli %arg6, %c1_i32_9 : i32
      %c0_i32_10 = arith.constant 0 : i32
      %6 = arith.addi %c0_i32_10, %5 : i32
      %c0_i32_11 = arith.constant 0 : i32
      %c0_i32_12 = arith.constant 0 : i32
      %7 = tpu.memref_slice %arg2[%c0_i32_11, %c0_i32_12] : memref<32x128xf32, #tpu.memory_space<any>> -> memref<1x128xf32, #tpu.memory_space<any>>
      %c0_i32_13 = arith.constant 0 : i32
      %8 = tpu.memref_slice %arg4[%6, %c0_i32_13] : memref<16x128xf32, #tpu.memory_space<vmem>> -> memref<1x128xf32, #tpu.memory_space<vmem>>
      tpu.wait_dma2 semaphore(%arg5 : memref<!tpu.dma_semaphore, #tpu.memory_space<semaphore_mem>>) src(%7 : memref<1x128xf32, #tpu.memory_space<any>>) dst(%8 : memref<1x128xf32, #tpu.memory_space<vmem>>)
    }
    %c16_i32_5 = arith.constant 16 : i32
    %c0 = arith.constant 0 : index
    %c0_6 = arith.constant 0 : index
    %3 = vector.load %arg4[%c0, %c0_6] : memref<16x128xf32, #tpu.memory_space<vmem>>, vector<16x128xf32>
    %c0_7 = arith.constant 0 : index
    %c0_8 = arith.constant 0 : index
    %4 = vector.load %arg3[%c0_7, %c0_8] : memref<16x128xf32, #tpu.memory_space<vmem>>, vector<16x128xf32>
    tpu.vector_store %arg3[%c0_7, %c0_8], %3 {strides = array<i32>} : memref<16x128xf32, #tpu.memory_space<vmem>>, vector<16x128xf32>,
    return
  }
  func.func @transform_1(%arg0: i32, %arg1: memref<16xi32, #tpu.memory_space<smem>>) -> (i32, i32) {
    %c0_i32 = arith.constant 0 : i32
    %c0_i32_0 = arith.constant 0 : i32
    return %arg0, %c0_i32 : i32, i32
  }
}

</mosaic_0001>

<bundles_post_ra>
// kernel: tpu_custom_call.1
= control target key start
LH: loop header
LB: loop body
LE: loop exit
PB: predicated region body
PF: predicated region fallthrough
CT: control target
= control target key end

     0   :  { %s192_s12 = smov [#allocation5]   ;;  %s237_s0 = inlined_call_operand.hbm [shape: s32[16], index: 0, kind: input, shape index: {}]   ;;  %s238_s1 = inlined_call_operand.hbm [shape: f32[32,128], index: 1, kind: input, shape index: {}]   ;;  %s239_s2 = inlined_call_operand.hbm [shape: f32[16,128], index: 2, kind: output, shape index: {}]  }
   0x1   :  { %s8_s11 = sshll.u32 %s237_s0, 4  ;;  %s9_s11 = int_to_ptr.hbm [resolvable:$true] %s8_s11 }
   0x2   :  { %11 = dma.hbm_to_smem %s9_s11, 16, %s192_s12, [#allocation4] }
   0x3   :  { %178 = dma.done.wait [#allocation4], 16 }
   0x4   :  { %179 = vsyncadd [#allocation4], 4294967280 }
   0x5   :  { %14 = sfence }
   0x6   :  { %15 = vsyncpa [#allocation7], 0  ;;  %s215_s13 = smov 0  }
   0x7 LB: > { %s24_s14 = sld [smem:[#allocation5 + %s186_s13]]  ;;  %s26_s15 = scalar_lea.vmem [#allocation2], %s186_s13  ;;  %s186_s13 = sphi %s215_s13, %s22_s13  }
   0x8   : > { %s36_s16 = sshll.u32 %s26_s15, 4  ;;  %s126_s24 = scalar_lea.hbm %s238_s1, 32  ;;  %s37_s16 = int_to_ptr.vmem [resolvable:$true] %s36_s16 }
   0xd   : > { %s25_s18 = scalar_lea.hbm %s238_s1, %s24_s14 }
   0xe   : > { %s34_s19 = sshll.u32 %s25_s18, 4  ;;  %s35_s19 = int_to_ptr.hbm [resolvable:$true] %s34_s19 }
   0xf   : > { %s122_s20 = sshra.s32 %s35_s19, 4  ;;  %s123_s20 = int_to_ptr.hbm [resolvable:$true] %s122_s20 }
  0x10   : > { %s124_s21 = scalar_lea.hbm %s123_s20, 1  ;;  %p127_p1 = scmp.lt.s32.totalorder %s123_s20, %s238_s1 }
  0x11   : > { %p125_p0 = scmp.ne.s32.totalorder %s123_s20, %s124_s21  ;;  %p128_p2 = scmp.lt.s32.totalorder %s126_s24, %s124_s21 }
  0x13   : > { %p129_p3 = por %p128_p2, %p127_p1 }
  0x15   : > { %p130_p4 = pnand %p129_p3, %p125_p0 }
  0x17   : > { %133 = shalt.err (!%p130_p4)  }
  0x18   : > { %s134_s27 = sshra.s32 %s37_s16, 4  ;;  %s193_s29 = smov [#allocation2]   ;;  %s135_s27 = int_to_ptr.vmem [resolvable:$true] %s134_s27 }
  0x19   : > { %s136_s28 = scalar_lea.vmem %s135_s27, 1  ;;  %s138_s30 = scalar_lea.vmem %s193_s29, 16 }
  0x1a   : > { %p137_p5 = scmp.ne.s32.totalorder %s135_s27, %s136_s28  ;;  %p139_p6 = scmp.lt.s32.totalorder %s135_s27, [#allocation2] }
  0x1b   : > { %p140_p7 = scmp.lt.s32.totalorder %s138_s30, %s136_s28 }
  0x1d   : > { %p141_p8 = por %p140_p7, %p139_p6 }
  0x1f   : > { %p142_p9 = pnand %p141_p8, %p137_p5 }
  0x21   : > { %145 = shalt.err (!%p142_p9)  }
  0x22   : > { %39 = dma.hbm_to_vmem [thread:$0]  %s35_s19, 16, %s37_s16, [#allocation3] }
  0x23   : > { %s22_s13 = sadd.s32 1, %s186_s13  }
  0x24   : > { %p19_p10 = scmp.ge.s32.totalorder %s22_s13, 16  }
  0x25   :  { %s188_s3 = smov (%p19_p10), 0  }
  0x26   :  { %21 = sbr.rel (!%p19_p10) target bundleno = 7 (0x7), region = 40 }
  0x2b LB: > { %180 = dma.done.wait [#allocation3], 16  ;;  %s190_s3 = sphi %s188_s3, %s45_s3  }
  0x2c   : > { %181 = vsyncadd [#allocation3], 4294967280  ;;  %s45_s3 = sadd.s32 1, %s190_s3  }
  0x2d   : > { %p42_p11 = scmp.ge.s32.totalorder %s45_s3, 16  }
  0x2e   :  { %v49_v0 = vld [vmem:[#allocation2] sm:$0xff] (%p42_p11)  ;;  %v50_v1 = vld [vmem:[#allocation2 + $0x8] sm:$0xff] (%p42_p11)  ;;  %s59_s6 = sshll.u32 (%p42_p11), %s239_s2, 4  ;;  %s194_s7 = smov (%p42_p11), [#allocation6]   ;;  %s60_s6 = int_to_ptr.hbm [resolvable:$true] %s59_s6 }
  0x2f   :  { %44 = sbr.rel (!%p42_p11) target bundleno = 43 (0x2b), region = 51  ;;  %51 = vst [vmem:[#allocation6] sm:$0xff] (%p42_p11), %v49_v0  ;;  %s57_s8 = sshll.u32 (%p42_p11), %s194_s7, 4  ;;  %s58_s8 = int_to_ptr.vmem [resolvable:$true] %s57_s8 }
  0x30   :  { %52 = vst [vmem:[#allocation6 + $0x8] sm:$0xff] (%p42_p11), %v50_v1  ;;  %s195_s1 = smov (%p42_p11), 128   ;;  %s196_s9 = smov (%p42_p11), 8  }
  0x31   :  { %65 = dma.vmem_to_hbm [thread:$0]  (%p42_p11), %s58_s8, 256, %s60_s6, [#allocation7], %s195_s1, %s195_s1, %s196_s9  }
  0x34   :  { %182 = dma.done.wait [#allocation7], 256  }
  0x35   :  { %183 = vsyncadd [#allocation7], 4294967040 }
  0x36   :  { %70 = vsyncpa [#allocation7], 1 }
  0x37   :  { %71 = vsyncmov [#allocation3] }
  0x3a   :  { %s72_s10 = vpop.sfrf %71 }
  0x3b   :  { %p89_p12 = scmp.ne.s32.totalorder %s72_s10, 0 }
  0x3d   :  { %76 = shalt.err (%p89_p12)  }

</bundles_post_ra>
